<compile_context>
chip_gen: v7x
topology: tpu7x:2x2x1
jax: 0.10.0
libtpu: 0.0.40
codegen_flags: <defaults>
</compile_context>

<pallas_src>
import random

import numpy as np
import jax
import jax.numpy as jnp
from jax import lax
from jax.experimental import pallas as pl
from jax.experimental.pallas import tpu as pltpu


# ---------------------------------------------------------------------------
# Host-side construction of interpolation / selection matrices (glue).
# ---------------------------------------------------------------------------
def _bilinear_matrix(out_size, in_size):
    """Row-stochastic matrix reproducing torch bilinear (align_corners=False,
    antialias=False) resize along one axis: out = M @ in."""
    scale = in_size / out_size
    m = np.zeros((out_size, in_size), dtype=np.float32)
    for d in range(out_size):
        src = (d + 0.5) * scale - 0.5
        src = max(src, 0.0)
        x0 = min(int(np.floor(src)), in_size - 1)
        x1 = min(x0 + 1, in_size - 1)
        lam1 = src - x0
        lam0 = 1.0 - lam1
        m[d, x0] += lam0
        m[d, x1] += lam1
    return m


def _nearest_matrix(out_size, in_size):
    """0/1 selection matrix reproducing torch 'nearest' resize along one axis."""
    scale = in_size / out_size
    m = np.zeros((out_size, in_size), dtype=np.float32)
    for d in range(out_size):
        src = min(int(np.floor(d * scale)), in_size - 1)
        m[d, src] = 1.0
    return m


def _build_static(orig_h, orig_w, sizes, seed):
    """Static shape bookkeeping + all host matrices (same RNG use as module)."""
    # TODO(synk): crop/pad offsets use python random.Random(seed), not torch RNG
    # (no bit parity), matching only the module's *distribution* of choices.
    rng = random.Random(seed)

    new_h = int(sizes[0] * orig_h)
    new_w = int(sizes[1] * orig_w)
    crop_h = min(int(sizes[2] * new_h), new_h)
    crop_w = min(int(sizes[3] * new_w), new_w)
    h, w = crop_h, crop_w

    # transforms.RandomCrop.get_params
    i = rng.randint(0, new_h - h)
    j = rng.randint(0, new_w - w)

    if h > orig_h or w > orig_w:
        raise ValueError("Crop size is larger than the original image size.")

    pad_top = rng.randint(0, max(0, orig_h - h))
    pad_left = rng.randint(0, max(0, orig_w - w))

    wh_img = _bilinear_matrix(new_h, orig_h)                 # (new_h, H)
    ww_img = _bilinear_matrix(new_w, orig_w)                 # (new_w, W)
    wh_msk = _nearest_matrix(new_h, orig_h)
    ww_msk = _nearest_matrix(new_w, orig_w)

    ph = np.zeros((orig_h, new_h), np.float32)               # crop rows -> out rows
    ph[pad_top + np.arange(h), i + np.arange(h)] = 1.0
    pw = np.zeros((orig_w, new_w), np.float32)               # crop cols -> out cols
    pw[pad_left + np.arange(w), j + np.arange(w)] = 1.0
    pwt = np.ascontiguousarray(pw.T)                         # (new_w, W_out)

    bg = np.ones((orig_h, orig_w), np.float32)               # 1 outside placed region
    bg[pad_top:pad_top + h, pad_left:pad_left + w] = 0.0

    # Combined matrices for the mask path (nearest resize is exact 0/1).
    a_msk = (ph @ wh_msk).astype(np.float32)                 # (H_out, H)
    b_msk = (ww_msk.T @ pwt).astype(np.float32)              # (W, W_out)

    return dict(new_h=new_h, new_w=new_w, crop_h=h, crop_w=w,
                crop_i=i, crop_j=j, pad_top=pad_top, pad_left=pad_left,
                wh_img=wh_img, wwt_img=np.ascontiguousarray(ww_img.T),
                ph=ph, pwt=pwt, bg=bg, a_msk=a_msk, b_msk=b_msk)


# ---------------------------------------------------------------------------
# Pallas kernels (hot path).  Each grid step processes TB slices.
# ---------------------------------------------------------------------------
def _make_image_kernel(crop_i, crop_j, crop_h, crop_w, pad_top, pad_left):
    """Bilinear resize (2 MXU matmuls) + min/max + static-slice crop/place."""

    def kernel(img_ref, wh_ref, wwt_ref, out_ref, min_ref, max_ref):
        tb, h, w = img_ref.shape
        new_h = wh_ref.shape[0]
        new_w = wwt_ref.shape[1]

        # ---- separable bilinear resize --------------------------------------
        # W axis: one MXU matmul over all TB slices (M = TB*H).
        t = jnp.dot(img_ref[...].reshape(tb * h, w), wwt_ref[...],
                    preferred_element_type=jnp.float32)              # (TB*H, new_w)
        t = t.reshape(tb, h, new_w)
        # H axis: batched matmul (batch = TB).
        # TODO(synk): bf16 operands would roughly double MXU throughput on
        # v6e/v7x; kept f32 to preserve bilinear precision.
        wh_b = jnp.broadcast_to(wh_ref[...], (tb, new_h, h))
        resized = lax.dot_general(
            wh_b, t, dimension_numbers=(((2,), (1,)), ((0,), (0,))),
            preferred_element_type=jnp.float32)                      # (TB, new_h, new_w)

        # ---- per-block min / max (lane-dense slab; global reduce in XLA) ----
        min_ref[...] = jnp.broadcast_to(jnp.min(resized, keepdims=True),
                                        min_ref.shape)
        max_ref[...] = jnp.broadcast_to(jnp.max(resized, keepdims=True),
                                        max_ref.shape)

        # ---- crop + place via static slices (no selection matmuls) ----------
        crop = resized[:, crop_i:crop_i + crop_h, crop_j:crop_j + crop_w]
        out_ref[...] = jnp.zeros_like(out_ref)
        out_ref[:, pad_top:pad_top + crop_h,
                pad_left:pad_left + crop_w] = crop

    return kernel


def _mask_kernel(msk_ref, a_ref, b_ref, out_ref):
    """Fused nearest-resize + crop + place via the two combined 0/1 matrices."""
    tb, h, w = msk_ref.shape
    out_h = a_ref.shape[0]
    out_w = b_ref.shape[1]

    t = jnp.dot(msk_ref[...].reshape(tb * h, w), b_ref[...],
                preferred_element_type=jnp.float32)                  # (TB*H, out_w)
    t = t.reshape(tb, h, out_w)
    a_b = jnp.broadcast_to(a_ref[...], (tb, out_h, h))
    out_ref[...] = lax.dot_general(
        a_b, t, dimension_numbers=(((2,), (1,)), ((0,), (0,))),
        preferred_element_type=jnp.float32)                          # (TB, out_h, out_w)


# ---------------------------------------------------------------------------
# Tiling helpers.
# ---------------------------------------------------------------------------
def _pick_tb(n_img, per_slice_floats, vmem_budget_bytes=12 * 1024 * 1024):
    """Slices per grid step: as many as fit a conservative VMEM budget
    (double-buffered in/out blocks + in-kernel intermediates)."""
    per_slice = 4 * max(per_slice_floats, 1)
    return int(max(1, min(n_img, vmem_budget_bytes // per_slice, 64)))


def _pad_to_multiple(x, tb):
    """Pad the leading axis to a multiple of tb by replicating slice 0 (this
    keeps the global min/max of the resized images unchanged)."""
    n = x.shape[0]
    g = -(-n // tb)
    pad = g * tb - n
    if pad:
        x = jnp.concatenate(
            [x, jnp.broadcast_to(x[:1], (pad,) + x.shape[1:])], axis=0)
    return x, g


# ---------------------------------------------------------------------------
# pallas_call wrappers.
# ---------------------------------------------------------------------------
def _image_pass(imgs, wh, wwt, st, tb):
    n_img, h, w = imgs.shape
    new_h, new_w = wh.shape[0], wwt.shape[1]
    out_h, out_w = h, w
    imgs_p, g = _pad_to_multiple(imgs, tb)

    kernel = _make_image_kernel(st["crop_i"], st["crop_j"],
                                st["crop_h"], st["crop_w"],
                                st["pad_top"], st["pad_left"])

    content, bmin, bmax = pl.pallas_call(
        kernel,
        out_shape=(
            jax.ShapeDtypeStruct((g * tb, out_h, out_w), jnp.float32),
            jax.ShapeDtypeStruct((g, 8, 128), jnp.float32),
            jax.ShapeDtypeStruct((g, 8, 128), jnp.float32),
        ),
        grid_spec=pltpu.PrefetchScalarGridSpec(
            num_scalar_prefetch=0,
            grid=(g,),
            in_specs=[
                pl.BlockSpec((tb, h, w), lambda n: (n, 0, 0)),
                pl.BlockSpec((new_h, h), lambda n: (0, 0)),
                pl.BlockSpec((w, new_w), lambda n: (0, 0)),
            ],
            out_specs=(
                pl.BlockSpec((tb, out_h, out_w), lambda n: (n, 0, 0)),
                pl.BlockSpec((1, 8, 128), lambda n: (n, 0, 0)),
                pl.BlockSpec((1, 8, 128), lambda n: (n, 0, 0)),
            ),
        ),
        compiler_params=pltpu.CompilerParams(
            dimension_semantics=("parallel",),
            vmem_limit_bytes=32 * 1024 * 1024),
    )(imgs_p, wh, wwt)

    return content[:n_img], jnp.min(bmin), jnp.max(bmax)


def _mask_pass(msks, a_m, b_m, tb):
    n_msk, h, w = msks.shape
    out_h, out_w = a_m.shape[0], b_m.shape[1]
    msks_p, g = _pad_to_multiple(msks, tb)

    content = pl.pallas_call(
        _mask_kernel,
        out_shape=jax.ShapeDtypeStruct((g * tb, out_h, out_w), jnp.float32),
        grid_spec=pltpu.PrefetchScalarGridSpec(
            num_scalar_prefetch=0,
            grid=(g,),
            in_specs=[
                pl.BlockSpec((tb, h, w), lambda n: (n, 0, 0)),
                pl.BlockSpec((out_h, h), lambda n: (0, 0)),
                pl.BlockSpec((w, out_w), lambda n: (0, 0)),
            ],
            out_specs=pl.BlockSpec((tb, out_h, out_w), lambda n: (n, 0, 0)),
        ),
        compiler_params=pltpu.CompilerParams(
            dimension_semantics=("parallel",),
            vmem_limit_bytes=32 * 1024 * 1024),
    )(msks_p, a_m, b_m)

    return content[:n_msk]


# ---------------------------------------------------------------------------
# Forward pass (equivalent of CropResizePad.forward with `sizes` provided).
# ---------------------------------------------------------------------------
def crop_resize_pad(images, masks, sizes, seed=0):
    b, c, orig_h, orig_w = images.shape
    bm, cm, mh, mw = masks.shape
    assert bm == b and (mh, mw) == (orig_h, orig_w)

    st = _build_static(orig_h, orig_w, sizes, seed)
    new_h, new_w = st["new_h"], st["new_w"]

    imgs_f = images.reshape(b * c, orig_h, orig_w).astype(jnp.float32)
    msks_f = masks.reshape(bm * cm, orig_h, orig_w).astype(jnp.float32)

    wh = jnp.asarray(st["wh_img"])
    wwt = jnp.asarray(st["wwt_img"])
    a_m = jnp.asarray(st["a_msk"])
    b_m = jnp.asarray(st["b_msk"])
    bg = jnp.asarray(st["bg"])

    # VMEM per slice (floats): in block (x2 for double buffer), W-resized t,
    # broadcast row matrix, resized, crop, out block (x2).
    img_floats = (2 * orig_h * orig_w + orig_h * new_w + new_h * orig_h
                  + new_h * new_w + st["crop_h"] * st["crop_w"]
                  + 2 * orig_h * orig_w)
    msk_floats = (2 * orig_h * orig_w + orig_h * orig_w + orig_h * orig_h
                  + 2 * orig_h * orig_w)
    tb_img = _pick_tb(b * c, img_floats)
    tb_msk = _pick_tb(bm * cm, msk_floats)

    content_img, vmin, vmax = _image_pass(imgs_f, wh, wwt, st, tb_img)
    content_msk = _mask_pass(msks_f, a_m, b_m, tb_msk)

    # pad_color = (max - min) * U[0,1) + min, per (batch, channel)
    # TODO(synk): drawn from jax.random, not torch.rand -> no bit parity with torch RNG.
    u = jax.random.uniform(jax.random.PRNGKey(seed), (b * c,), dtype=jnp.float32)
    pad_color = (vmax - vmin) * u + vmin

    # The kernels leave zeros outside the placed crop, so the background fill
    # is a single fused XLA elementwise op.
    padded_imgs = content_img + pad_color[:, None, None] * bg[None]
    padded_imgs = padded_imgs.reshape(b, c, orig_h, orig_w).astype(images.dtype)
    padded_msks = content_msk.reshape(bm, cm, orig_h, orig_w).astype(masks.dtype)
    return padded_imgs, padded_msks


# ---------------------------------------------------------------------------
# Pure-JAX reference (same host matrices / RNG), used only for verification.
# ---------------------------------------------------------------------------
def _reference(images, masks, sizes, seed=0):
    b, c, orig_h, orig_w = images.shape
    bm, cm, _, _ = masks.shape
    st = _build_static(orig_h, orig_w, sizes, seed)
    wh = jnp.asarray(st["wh_img"])
    ww = jnp.asarray(st["wwt_img"]).T
    ph = jnp.asarray(st["ph"])
    pwt = jnp.asarray(st["pwt"])
    bg = jnp.asarray(st["bg"])
    a_m = jnp.asarray(st["a_msk"])
    b_m = jnp.asarray(st["b_msk"])

    x = images.reshape(b * c, orig_h, orig_w).astype(jnp.float32)
    m = masks.reshape(bm * cm, orig_h, orig_w).astype(jnp.float32)

    resized = jnp.einsum('nh,bhw,mw->bnm', wh, x, ww)
    content = jnp.einsum('on,bnm,mq->boq', ph, resized, pwt)
    vmin, vmax = jnp.min(resized), jnp.max(resized)
    u = jax.random.uniform(jax.random.PRNGKey(seed), (b * c,), dtype=jnp.float32)
    pad_color = (vmax - vmin) * u + vmin
    imgs = (content + pad_color[:, None, None] * bg[None]).reshape(b, c, orig_h, orig_w)
    msks = jnp.einsum('oh,bhw,wq->boq', a_m, m, b_m).reshape(bm, cm, orig_h, orig_w)
    return imgs.astype(images.dtype), msks.astype(masks.dtype)


# ---------------------------------------------------------------------------
if __name__ == "__main__":
    key = jax.random.PRNGKey(0)
    k1, k2 = jax.random.split(key)

    B, C, H, W = 2, 4, 16, 16
    images = jax.random.normal(k1, (B, C, H, W), dtype=jnp.float32)
    masks = (jax.random.uniform(k2, (B, 1, H, W)) > 0.5).astype(jnp.float32)

    # sizes = (resize_h_frac, resize_w_frac, crop_h_frac, crop_w_frac)
    sizes = (1.25, 1.25, 0.6, 0.6)   # resize 16->20, crop 12x12, pad back to 16

    padded_images, padded_masks = crop_resize_pad(images, masks, sizes, seed=0)
    jax.block_until_ready((padded_images, padded_masks))

    ref_images, ref_masks = _reference(images, masks, sizes, seed=0)

    assert padded_images.shape == (B, C, H, W)
    assert padded_masks.shape == (B, 1, H, W)
    assert bool(jnp.all(jnp.isfinite(padded_images)))
    np.testing.assert_allclose(np.asarray(padded_images), np.asarray(ref_images),
                               atol=5e-2, rtol=5e-2)
    np.testing.assert_allclose(np.asarray(padded_masks), np.asarray(ref_masks),
                               atol=5e-2, rtol=5e-2)
    print("KERNEL_OK")
</pallas_src>

<mosaic_0001>
module attributes {stable_mosaic.version = 11 : i64} {
  func.func @kernel(%arg0: i32, %arg1: memref<8x16x16xf32, #tpu.memory_space<vmem>>, %arg2: memref<20x16xf32, #tpu.memory_space<vmem>>, %arg3: memref<16x20xf32, #tpu.memory_space<vmem>>, %arg4: memref<8x16x16xf32, #tpu.memory_space<vmem>>, %arg5: memref<1x8x128xf32, #tpu.memory_space<vmem>>, %arg6: memref<1x8x128xf32, #tpu.memory_space<vmem>>) attributes {dimension_semantics = [#tpu.dimension_semantics<parallel>], iteration_bounds = array<i64: 1>, scalar_prefetch = 0 : i64, scratch_operands = 0 : i64, tpu.core_type = #tpu.core_type<tc>, window_params = [{transform_indices = @transform_0, window_bounds = array<i64: 8, 16, 16>}, {pipeline_mode = #tpu.pipeline_mode<synchronous>, transform_indices = @transform_1, window_bounds = array<i64: 20, 16>}, {pipeline_mode = #tpu.pipeline_mode<synchronous>, transform_indices = @transform_2, window_bounds = array<i64: 16, 20>}, {transform_indices = @transform_3, window_bounds = array<i64: 8, 16, 16>}, {transform_indices = @transform_4, window_bounds = array<i64: 1, 8, 128>}, {transform_indices = @transform_5, window_bounds = array<i64: 1, 8, 128>}]} {
    %c0 = arith.constant 0 : index
    %c0_0 = arith.constant 0 : index
    %c0_1 = arith.constant 0 : index
    %0 = vector.load %arg1[%c0, %c0_0, %c0_1] : memref<8x16x16xf32, #tpu.memory_space<vmem>>, vector<8x16x16xf32>
    %1 = vector.shape_cast %0 : vector<8x16x16xf32> to vector<128x16xf32>
    %c0_2 = arith.constant 0 : index
    %c0_3 = arith.constant 0 : index
    %2 = vector.load %arg3[%c0_2, %c0_3] : memref<16x20xf32, #tpu.memory_space<vmem>>, vector<16x20xf32>
    %cst = arith.constant dense<0.000000e+00> : vector<128x20xf32>
    %3 = tpu.matmul %1, %2, %cst {dimension_numbers = #tpu.dot_dimension_numbers<[1], [0], [0], [1], [0, 0, 1, 1], [], []>} : vector<128x16xf32>, vector<16x20xf32>, vector<128x20xf32> -> vector<128x20xf32>
    %4 = vector.shape_cast %3 : vector<128x20xf32> to vector<8x16x20xf32>
    %c0_4 = arith.constant 0 : index
    %c0_5 = arith.constant 0 : index
    %5 = vector.load %arg2[%c0_4, %c0_5] : memref<20x16xf32, #tpu.memory_space<vmem>>, vector<20x16xf32>
    %6 = vector.shape_cast %5 : vector<20x16xf32> to vector<1x20x16xf32>
    %7 = vector.broadcast %6 : vector<1x20x16xf32> to vector<8x20x16xf32>
    %cst_6 = arith.constant dense<0.000000e+00> : vector<8x20x20xf32>
    %8 = tpu.matmul %7, %4, %cst_6 {dimension_numbers = #tpu.dot_dimension_numbers<[2], [1], [1], [2], [0, 0, 0, 1, 1, 2], [0], [0]>} : vector<8x20x16xf32>, vector<8x16x20xf32>, vector<8x20x20xf32> -> vector<8x20x20xf32>
    %9 = vector.shape_cast %8 : vector<8x20x20xf32> to vector<1x8x20x20xf32>
    %cst_7 = arith.constant dense<0x7F800000> : vector<1xf32>
    %10 = vector.multi_reduction <minimumf>, %9, %cst_7 [1, 2, 3] : vector<1x8x20x20xf32> to vector<1xf32>
    %11 = vector.shape_cast %10 : vector<1xf32> to vector<1x1x1x1xf32>
    %12 = vector.extract %11[0, 0, 0, 0] : f32 from vector<1x1x1x1xf32>
    %13 = vector.broadcast %12 : f32 to vector<1x1x1xf32>
    %14 = vector.shape_cast %13 : vector<1x1x1xf32> to vector<1x1x1xf32>
    %15 = vector.broadcast %14 : vector<1x1x1xf32> to vector<1x8x128xf32>
    %c0_8 = arith.constant 0 : index
    %c0_9 = arith.constant 0 : index
    %c0_10 = arith.constant 0 : index
    %16 = vector.load %arg5[%c0_8, %c0_9, %c0_10] : memref<1x8x128xf32, #tpu.memory_space<vmem>>, vector<1x8x128xf32>
    tpu.vector_store %arg5[%c0_8, %c0_9, %c0_10], %15 {strides = array<i32>} : memref<1x8x128xf32, #tpu.memory_space<vmem>>, vector<1x8x128xf32>,
    %17 = vector.shape_cast %8 : vector<8x20x20xf32> to vector<1x8x20x20xf32>
    %cst_11 = arith.constant dense<0xFF800000> : vector<1xf32>
    %18 = vector.multi_reduction <maximumf>, %17, %cst_11 [1, 2, 3] : vector<1x8x20x20xf32> to vector<1xf32>
    %19 = vector.shape_cast %18 : vector<1xf32> to vector<1x1x1x1xf32>
    %20 = vector.extract %19[0, 0, 0, 0] : f32 from vector<1x1x1x1xf32>
    %21 = vector.broadcast %20 : f32 to vector<1x1x1xf32>
    %22 = vector.shape_cast %21 : vector<1x1x1xf32> to vector<1x1x1xf32>
    %23 = vector.broadcast %22 : vector<1x1x1xf32> to vector<1x8x128xf32>
    %c0_12 = arith.constant 0 : index
    %c0_13 = arith.constant 0 : index
    %c0_14 = arith.constant 0 : index
    %24 = vector.load %arg6[%c0_12, %c0_13, %c0_14] : memref<1x8x128xf32, #tpu.memory_space<vmem>>, vector<1x8x128xf32>
    tpu.vector_store %arg6[%c0_12, %c0_13, %c0_14], %23 {strides = array<i32>} : memref<1x8x128xf32, #tpu.memory_space<vmem>>, vector<1x8x128xf32>,
    %25 = vector.extract_strided_slice %8 {offsets = [0, 6, 6], sizes = [8, 12, 12], strides = [1, 1, 1]} : vector<8x20x20xf32> to vector<8x12x12xf32>
    %cst_15 = arith.constant 0.000000e+00 : f32
    %26 = vector.broadcast %cst_15 : f32 to vector<8x16x16xf32>
    %c0_16 = arith.constant 0 : index
    %c0_17 = arith.constant 0 : index
    %c0_18 = arith.constant 0 : index
    %27 = vector.load %arg4[%c0_16, %c0_17, %c0_18] : memref<8x16x16xf32, #tpu.memory_space<vmem>>, vector<8x16x16xf32>
    tpu.vector_store %arg4[%c0_16, %c0_17, %c0_18], %26 {strides = array<i32>} : memref<8x16x16xf32, #tpu.memory_space<vmem>>, vector<8x16x16xf32>,
    %c0_19 = arith.constant 0 : index
    %c0_20 = arith.constant 0 : index
    %c2 = arith.constant 2 : index
    %28 = vector.load %arg4[%c0_19, %c0_20, %c2] : memref<8x16x16xf32, #tpu.memory_space<vmem>>, vector<8x12x12xf32>
    tpu.vector_store %arg4[%c0_19, %c0_20, %c2], %25 {strides = array<i32>} : memref<8x16x16xf32, #tpu.memory_space<vmem>>, vector<8x12x12xf32>,
    return
  }
  func.func @transform_0(%arg0: i32) -> (i32, i32, i32) {
    %c0_i32 = arith.constant 0 : i32
    %c0_i32_0 = arith.constant 0 : i32
    %c0_i32_1 = arith.constant 0 : i32
    return %arg0, %c0_i32, %c0_i32_0 : i32, i32, i32
  }
  func.func @transform_1(%arg0: i32) -> (i32, i32) {
    %c0_i32 = arith.constant 0 : i32
    %c0_i32_0 = arith.constant 0 : i32
    %c0_i32_1 = arith.constant 0 : i32
    return %c0_i32, %c0_i32_0 : i32, i32
  }
  func.func @transform_2(%arg0: i32) -> (i32, i32) {
    %c0_i32 = arith.constant 0 : i32
    %c0_i32_0 = arith.constant 0 : i32
    %c0_i32_1 = arith.constant 0 : i32
    return %c0_i32, %c0_i32_0 : i32, i32
  }
  func.func @transform_3(%arg0: i32) -> (i32, i32, i32) {
    %c0_i32 = arith.constant 0 : i32
    %c0_i32_0 = arith.constant 0 : i32
    %c0_i32_1 = arith.constant 0 : i32
    return %arg0, %c0_i32, %c0_i32_0 : i32, i32, i32
  }
  func.func @transform_4(%arg0: i32) -> (i32, i32, i32) {
    %c0_i32 = arith.constant 0 : i32
    %c0_i32_0 = arith.constant 0 : i32
    %c0_i32_1 = arith.constant 0 : i32
    return %arg0, %c0_i32, %c0_i32_0 : i32, i32, i32
  }
  func.func @transform_5(%arg0: i32) -> (i32, i32, i32) {
    %c0_i32 = arith.constant 0 : i32
    %c0_i32_0 = arith.constant 0 : i32
    %c0_i32_1 = arith.constant 0 : i32
    return %arg0, %c0_i32, %c0_i32_0 : i32, i32, i32
  }
}

</mosaic_0001>

<bundles_post_ra>
// kernel: tpu_custom_call.1
= control target key start
LH: loop header
LB: loop body
LE: loop exit
PB: predicated region body
PF: predicated region fallthrough
CT: control target
= control target key end

     0   :  { %11 = vsyncpa [#allocation3], 0  ;;  %s2010_s0 = inlined_call_operand.hbm [shape: f32[8,16,16], index: 0, kind: input, shape index: {}]   ;;  %s2011_s1 = inlined_call_operand.vmem [shape: f32[20,16], index: 1, kind: input, shape index: {}]   ;;  %s2012_s2 = inlined_call_operand.vmem [shape: f32[16,20], index: 2, kind: input, shape index: {}]   ;;  %s2013_s3 = inlined_call_operand.hbm [shape: f32[8,16,16], index: 3, kind: output, shape index: {0}]   ;;  %s2014_s4 = inlined_call_operand.hbm [shape: f32[1,8,128], index: 4, kind: output, shape index: {1}]   ;;  %s2015_s5 = inlined_call_operand.hbm [shape: f32[1,8,128], index: 5, kind: output, shape index: {2}]  }
   0x1   :  { %12 = vsyncpa [#allocation4], 0 }
   0x2   :  { %13 = vsyncpa [#allocation7], 0  ;;  %s1566_s18 = smov [#allocation2]   ;;  %s1472_s22 = scalar_lea.hbm %s2010_s0, 2048 }
   0x3   :  { %s19_s19 = sshll.u32 %s1566_s18, 4  ;;  %p1473_p0 = scmp.ne.s32.totalorder %s2010_s0, %s1472_s22  ;;  %s20_s19 = int_to_ptr.vmem [resolvable:$true] %s19_s19 }
   0x4   :  { %p1476_p1 = scmp.lt.u32.totalorder %s1472_s22, %s2010_s0 }
   0x6   :  { %p1478_p2 = pnand %p1476_p1, %p1473_p0 }
   0x8   :  { %1481 = shalt.err (!%p1478_p2)
}
   0x9   :  { %s1482_s27 = scalar_lea.vmem %s20_s19, 2048  ;;  %p1487_p4 = scmp.lt.s32.totalorder %s20_s19, %s20_s19 }
   0xa   :  { %p1483_p3 = scmp.ne.s32.totalorder %s20_s19, %s1482_s27  ;;  %p1488_p5 = scmp.lt.s32.totalorder %s1482_s27, %s1482_s27 }
   0xc   :  { %p1489_p6 = por %p1488_p5, %p1487_p4 }
   0xe   :  { %p1490_p7 = pnand %p1489_p6, %p1483_p3 }
  0x10   :  { %1493 = shalt.err (!%p1490_p7)
}
  0x11   :  { %s1567_s28 = smov 128   ;;  %s1568_s29 = smov 8  }
  0x12   :  { %25 = dma.hbm_to_vmem [thread:$0]  %s2010_s0, 2048, %s20_s19, [#allocation3], %s1567_s28, %s1567_s28, %s1568_s29  }
  0x13   :  { %1560 = dma.done.wait [#allocation3], 2048  }
  0x14   :  { %1561 = vsyncadd [#allocation3], 4294965248  ;;  %vm51_vm0 = vcmask 130048   ;;  %v49_v0 = vld [vmem:[%s2012_s2] sm:$0xff]  ;;  %v50_v1 = vld [vmem:[%s2012_s2 + $0x8] sm:$0xff]  ;;  %v1569_v19 = vmov 0.0|0.0  }
  0x15   :  { %v33_v2 = vld [vmem:[#allocation2] sm:$0xff]  ;;  %v1428_v3 = vpack.c.bf16 %v50_v1, %v49_v0  ;;  %v34_v4 = vld [vmem:[#allocation2 + $0x8] sm:$0xff]  ;;  %v47_v5 = vld [vmem:[#allocation2 + $0x70] sm:$0xff]  ;;  %vm1570_vm1 = vmmov 0   ;;  %v1571_v20 = vmov 0.0   ;;  %vm897_vm2 = vcmask 162816  }
  0x16   :  { %1300 = vmatprep.mubr.msk.f32.mxu0 %vm51_vm0, %v33_v2  ;;  %v35_v6 = vld [vmem:[#allocation2 + $0x10] sm:$0xff]  ;;  %1321 = vmatprep.mubr.msk.f32.mxu1 %vm51_vm0, %v47_v5  ;;  %v48_v7 = vld [vmem:[#allocation2 + $0x78] sm:$0xff]  ;;  %v37_v9 = vld [vmem:[#allocation2 + $0x20] sm:$0xff]  ;;  %1015 = vst.msk [vmem:[#allocation5] sm:$0xff] %vm51_vm0, %v1571_v20  ;;  %vm900_vm3 = vcmask 158720   ;;  %vm1127_vm4 = vcmask 113686  }
  0x17   :  { %1429 = vmatprep.subr.bf16.mxu0 %v1428_v3  ;;  %1456 = vmatprep.subr.bf16.mxu1 %v1428_v3  ;;  %v36_v8 = vld [vmem:[#allocation2 + $0x18] sm:$0xff]  ;;  %v38_v10 = vld [vmem:[#allocation2 + $0x28] sm:$0xff]  ;;  %v39_v11 = vld [vmem:[#allocation2 + $0x30] sm:$0xff]  ;;  %1016 = vst.msk [vmem:[#allocation5 + $0x8] sm:$0xff] %vm51_vm0, %v1571_v20  ;;  %vm1129_vm5 = vcmask 113680   ;;  %vm1131_vm6 = vcmask 107536  }
  0x18   :  { %1431 = vmatpush3.bf16.msra.mxu0 %v1428_v3  ;;  %1457 = vmatpush3.bf16.msra.mxu1 %v1428_v3  ;;  %v40_v12 = vld [vmem:[#allocation2 + $0x38] sm:$0xff]  ;;  %v41_v13 = vld [vmem:[#allocation2 + $0x40] sm:$0xff]  ;;  %v42_v14 = vld [vmem:[#allocation2 + $0x48] sm:$0xff]  ;;  %1017 = vst.msk [vmem:[#allocation5 + $0x10] sm:$0xff] %vm51_vm0, %v1571_v20  ;;  %s1573_s15 = smov [#allocation5]  }
  0x19   :  { %v43_v15 = vld [vmem:[#allocation2 + $0x50] sm:$0xff]  ;;  %v44_v16 = vld [vmem:[#allocation2 + $0x58] sm:$0xff]  ;;  %v45_v17 = vld [vmem:[#allocation2 + $0x60] sm:$0xff]  ;;  %1432 = vmatprep.subr.bf16.mxu1 %v1569_v19  ;;  %1441 = vmatprep.subr.bf16.mxu0 %v1569_v19  ;;  %1018 = vst.msk [vmem:[#allocation5 + $0x18] sm:$0xff] %vm51_vm0, %v1571_v20  ;;  %s1159_s16 = sshll.u32 %s1573_s15, 4  ;;  %s1160_s16 = int_to_ptr.vmem [resolvable:$true] %s1159_s16 }
  0x1a   :  { %v46_v18 = vld [vmem:[#allocation2 + $0x68] sm:$0xff]  ;;  %1019 = vst.msk [vmem:[#allocation5 + $0x20] sm:$0xff] %vm51_vm0, %v1571_v20  ;;  %1020 = vst.msk [vmem:[#allocation5 + $0x28] sm:$0xff] %vm51_vm0, %v1571_v20  ;;  %v1684_v28 = vld [vmem:[%s2011_s1] sm:$0xff]  ;;  %s1494_s17 = scalar_lea.vmem %s1160_s16, 2048  ;;  %p1499_p9 = scmp.lt.s32.totalorder %s1160_s16, %s1160_s16 }
  0x1b   :  { %1301 = vmatmul.mubr.msk.f32.vlgmr.msra.gmra.mrb[0].mxu0 %vm51_vm0, %v34_v4  ;;  %1322 = vmatmul.mubr.msk.f32.vlgmr.msra.gmra.mrb[0].mxu1 %vm51_vm0, %v48_v7  ;;  %1021 = vst.msk [vmem:[#allocation5 + $0x30] sm:$0xff] %vm51_vm0, %v1571_v20  ;;  %1022 = vst.msk [vmem:[#allocation5 + $0x38] sm:$0xff] %vm51_vm0, %v1571_v20  ;;  %v1694_v32 = vld [vmem:[%s2011_s1 + $0x8] sm:$0xff]  ;;  %v1704_v36 = vld [vmem:[%s2011_s1 + $0x10] sm:$0xf]  ;;  %s1572_s1 = smov 124   ;;  %p1495_p8 = scmp.ne.s32.totalorder %s1160_s16, %s1494_s17 }
  0x1c   :  { %1303 = vmatprep.mubr.msk.f32.mxu0 %vm51_vm0, %v35_v6  ;;  %1328 = vmatprep.mubr.msk.f32.mxu1 %vm1570_vm1, %v1571_v20  ;;  %1023 = vst.msk [vmem:[#allocation5 + $0x40] sm:$0xff] %vm51_vm0, %v1571_v20  ;;  %1024 = vst.msk [vmem:[#allocation5 + $0x48] sm:$0xff] %vm51_vm0, %v1571_v20  ;;  %p1500_p10 = scmp.lt.s32.totalorder %s1494_s17, %s1494_s17 }
  0x1d   :  { %1025 = vst.msk [vmem:[#allocation5 + $0x50] sm:$0xff] %vm51_vm0, %v1571_v20  ;;  %1026 = vst.msk [vmem:[#allocation5 + $0x58] sm:$0xff] %vm51_vm0, %v1571_v20 }
  0x1e   :  { %1027 = vst.msk [vmem:[#allocation5 + $0x60] sm:$0xff] %vm51_vm0, %v1571_v20  ;;  %1028 = vst.msk [vmem:[#allocation5 + $0x68] sm:$0xff] %vm51_vm0, %v1571_v20  ;;  %p1501_p11 = por %p1500_p10, %p1499_p9 }
  0x1f   :  { %1304 = vmatmul.mubr.msk.f32.gmra.mrb[2].mxu0 %vm51_vm0, %v36_v8  ;;  %1029 = vst.msk [vmem:[#allocation5 + $0x70] sm:$0xff] %vm51_vm0, %v1571_v20  ;;  %1030 = vst.msk [vmem:[#allocation5 + $0x78] sm:$0xff] %vm51_vm0, %v1571_v20 }
  0x20   :  { %1306 = vmatprep.mubr.msk.f32.mxu0 %vm51_vm0, %v37_v9  ;;  %p1502_p12 = pnand %p1501_p11, %p1495_p8 }
  0x23   :  { %1307 = vmatmul.mubr.msk.f32.gmra.mrb[4].mxu0 %vm51_vm0, %v38_v10 }
  0x24   :  { %1309 = vmatprep.mubr.msk.f32.mxu0 %vm51_vm0, %v39_v11 }
  0x27   :  { %1310 = vmatmul.mubr.msk.f32.gmra.mrb[6].mxu0 %vm51_vm0, %v40_v12 }
  0x28   :  { %1312 = vmatprep.mubr.msk.f32.mxu0 %vm51_vm0, %v41_v13 }
  0x2b   :  { %1313 = vmatmul.mubr.msk.f32.gmra.mrb[8].mxu0 %vm51_vm0, %v42_v14 }
  0x2c   :  { %1315 = vmatprep.mubr.msk.f32.mxu0 %vm51_vm0, %v43_v15 }
  0x2f   :  { %1316 = vmatmul.mubr.msk.f32.gmra.mrb[10].mxu0 %vm51_vm0, %v44_v16 }
  0x30   :  { %1318 = vmatprep.mubr.msk.f32.mxu0 %vm51_vm0, %v45_v17 }
  0x33   :  { %1319 = vmatmul.mubr.msk.f32.gmra.mrb[12].mxu0 %vm51_vm0, %v46_v18 }
  0x34   :  { %1367 = vmatprep.mubr.msk.f32.mxu0 %vm1570_vm1, %v1571_v20 }
  0xee   :  { %v1302_v21 = vpop.f32.mrb[0].mxu0  ;;  %v1323_v22 = vpop.f32.mrb[0].mxu1 }
  0xef   :  { %v166_v23 = vpop.f32.mrb[1].mxu0  ;;  %v236_v24 = vpop.f32.mrb[1].mxu1 }
  0xf0   :  { %v1433_v25 = vpack.c.bf16 %v1302_v21, %v166_v23  ;;  %v1454_v26 = vpack.c.bf16 %v1323_v22, %v236_v24 }
  0xf2   :  { %v1305_v27 = vpop.f32.mrb[2].mxu0  ;;  %1434 = vmatpush3.bf16.msra.mxu1 %v1433_v25 }
  0xf3   :  { %v176_v29 = vpop.f32.mrb[3].mxu0  ;;  %1435 = vmatprep.subr.bf16.mxu1 %v1569_v19 }
  0xf4   :  { %v1436_v30 = vpack.c.bf16 %v1305_v27, %v176_v29 }
  0xf5   :  { %1329 = vmatmul.mubr.msk.f32.vlgmr.msra.gmra.mrb[2].mxu1 %vm51_vm0, %v1684_v28 }
  0xf6   :  { %v1308_v31 = vpop.f32.mrb[4].mxu0  ;;  %1437 = vmatpush3.bf16.msra.mxu1 %v1436_v30  ;;  %1331 = vmatprep.mubr.msk.f32.mxu1 %vm1570_vm1, %v1571_v20 }
  0xf7   :  { %v186_v33 = vpop.f32.mrb[5].mxu0  ;;  %1438 = vmatprep.subr.bf16.mxu1 %v1569_v19 }
  0xf8   :  { %v1439_v34 = vpack.c.bf16 %v1308_v31, %v186_v33 }
  0xf9   :  { %1332 = vmatmul.mubr.msk.f32.gmra.mrb[4].mxu1 %vm51_vm0, %v1694_v32 }
  0xfa   :  { %v1311_v35 = vpop.f32.mrb[6].mxu0  ;;  %1334 = vmatprep.mubr.msk.f32.mxu1 %vm1570_vm1, %v1571_v20 }
  0xfb   :  { %v196_v37 = vpop.f32.mrb[7].mxu0 }
  0xfc   :  { %v1442_v38 = vpack.c.bf16 %v1311_v35, %v196_v37 }
  0xfd   :  { %1335 = vmatmul.mubr.msk.f32.gmra.mrb[6].mxu1 %vm51_vm0, %v1704_v36 }
  0xfe   :  { %1443 = vmatpush3.bf16.msra.mxu0 %v1442_v38  ;;  %1341 = vmatprep.mubr.msk.f32.mxu1 %vm1570_vm1, %v1571_v20  ;;  %v1314_v39 = vpop.f32.mrb[8].mxu0 }
  0xff   :  { %v206_v40 = vpop.f32.mrb[9].mxu0  ;;  %1447 = vmatprep.subr.bf16.mxu0 %v1569_v19 }
 0x100   :  { %v1445_v41 = vpack.c.bf16 %v1314_v39, %v206_v40 }
 0x101   :  { %1342 = vmatmul.mubr.msk.f32.vlgmr.msra.gmra.mrb[8].mxu1 %vm51_vm0, %v1684_v28  ;;  %1368 = vmatmul.mubr.msk.f32.vlgmr.msra.gmra.mrb[14].mxu0 %vm51_vm0, %v1684_v28 }
 0x102   :  { %1440 = vmatpush3.bf16.msra.mxu1 %v1439_v34  ;;  %1344 = vmatprep.mubr.msk.f32.mxu1 %vm1570_vm1, %v1571_v20  ;;  %v1317_v42 = vpop.f32.mrb[10].mxu0 }
 0x103   :  { %1370 = vmatprep.mubr.msk.f32.mxu0 %vm1570_vm1, %v1571_v20  ;;  %v216_v43 = vpop.f32.mrb[11].mxu0  ;;  %1444 = vmatprep.subr.bf16.mxu1 %v1569_v19 }
 0x104   :  { %v1448_v44 = vpack.c.bf16 %v1317_v42, %v216_v43 }
 0x105   :  { %1345 = vmatmul.mubr.msk.f32.gmra.mrb[10].mxu1 %vm51_vm0, %v1694_v32  ;;  %1371 = vmatmul.mubr.msk.f32.gmra.mrb[16].mxu0 %vm51_vm0, %v1694_v32 }
 0x106   :  { %1347 = vmatprep.mubr.msk.f32.mxu1 %vm1570_vm1, %v1571_v20  ;;  %1373 = vmatprep.mubr.msk.f32.mxu0 %vm1570_vm1, %v1571_v20  ;;  %v1320_v45 = vpop.f32.mrb[12].mxu0 }
 0x107   :  { %1449 = vmatpush3.bf16.msra.mxu0 %v1448_v44  ;;  %v226_v46 = vpop.f32.mrb[13].mxu0 }
 0x108   :  { %1453 = vmatprep.subr.bf16.mxu0 %v1569_v19  ;;  %v1451_v47 = vpack.c.bf16 %v1320_v45, %v226_v46 }
 0x109   :  { %1348 = vmatmul.mubr.msk.f32.gmra.mrb[12].mxu1 %vm51_vm0, %v1704_v36  ;;  %1374 = vmatmul.mubr.msk.f32.gmra.mrb[18].mxu0 %vm51_vm0, %v1704_v36 }
 0x10a   :  { %1354 = vmatprep.mubr.msk.f32.mxu1 %vm1570_vm1, %v1571_v20  ;;  %1393 = vmatprep.mubr.msk.f32.mxu0 %vm1570_vm1, %v1571_v20 }
 0x10d   :  { %1355 = vmatmul.mubr.msk.f32.vlgmr.msra.gmra.mrb[14].mxu1 %vm51_vm0, %v1684_v28  ;;  %1394 = vmatmul.mubr.msk.f32.vlgmr.msra.gmra.mrb[20].mxu0 %vm51_vm0, %v1684_v28 }
 0x10e   :  { %1357 = vmatprep.mubr.msk.f32.mxu1 %vm1570_vm1, %v1571_v20  ;;  %1446 = vmatpush3.bf16.msra.mxu1 %v1445_v41 }
 0x10f   :  { %1396 = vmatprep.mubr.msk.f32.mxu0 %vm1570_vm1, %v1571_v20  ;;  %1455 = vmatpush3.bf16.msra.mxu0 %v1454_v26 }
 0x110   :  { %1450 = vmatprep.subr.bf16.mxu1 %v1569_v19 }
 0x111   :  { %1358 = vmatmul.mubr.msk.f32.gmra.mrb[16].mxu1 %vm51_vm0, %v1694_v32  ;;  %1397 = vmatmul.mubr.msk.f32.gmra.mrb[22].mxu0 %vm51_vm0, %v1694_v32 }
 0x112   :  { %1360 = vmatprep.mubr.msk.f32.mxu1 %vm1570_vm1, %v1571_v20  ;;  %1399 = vmatprep.mubr.msk.f32.mxu0 %vm1570_vm1, %v1571_v20 }
 0x115   :  { %1361 = vmatmul.mubr.msk.f32.gmra.mrb[18].mxu1 %vm51_vm0, %v1704_v36  ;;  %1400 = vmatmul.mubr.msk.f32.gmra.mrb[24].mxu0 %vm51_vm0, %v1704_v36 }
 0x116   :  { %1380 = vmatprep.mubr.msk.f32.mxu1 %vm1570_vm1, %v1571_v20  ;;  %1419 = vmatprep.mubr.msk.f32.mxu0 %vm1570_vm1, %v1571_v20 }
 0x119   :  { %1381 = vmatmul.mubr.msk.f32.vlgmr.msra.gmra.mrb[20].mxu1 %vm51_vm0, %v1684_v28  ;;  %1420 = vmatmul.mubr.msk.f32.vlgmr.msra.gmra.mrb[26].mxu0 %vm51_vm0, %v1684_v28 }
 0x11a   :  { %1383 = vmatprep.mubr.msk.f32.mxu1 %vm1570_vm1, %v1571_v20  ;;  %1452 = vmatpush3.bf16.msra.mxu1 %v1451_v47 }
 0x11b   :  { %1422 = vmatprep.mubr.msk.f32.mxu0 %vm1570_vm1, %v1571_v20 }
 0x11d   :  { %1384 = vmatmul.mubr.msk.f32.gmra.mrb[22].mxu1 %vm51_vm0, %v1694_v32  ;;  %1423 = vmatmul.mubr.msk.f32.gmra.mrb[28].mxu0 %vm51_vm0, %v1694_v32 }
 0x11e   :  { %1386 = vmatprep.mubr.msk.f32.mxu1 %vm1570_vm1, %v1571_v20  ;;  %1425 = vmatprep.mubr.msk.f32.mxu0 %vm1570_vm1, %v1571_v20 }
 0x121   :  { %1387 = vmatmul.mubr.msk.f32.gmra.mrb[24].mxu1 %vm51_vm0, %v1704_v36  ;;  %1426 = vmatmul.mubr.msk.f32.gmra.mrb[30].mxu0 %vm51_vm0, %v1704_v36 }
 0x122   :  { %1406 = vmatprep.mubr.msk.f32.mxu1 %vm1570_vm1, %v1571_v20 }
 0x125   :  { %1407 = vmatmul.mubr.msk.f32.vlgmr.msra.gmra.mrb[26].mxu1 %vm51_vm0, %v1684_v28 }
 0x126   :  { %1409 = vmatprep.mubr.msk.f32.mxu1 %vm1570_vm1, %v1571_v20 }
 0x129   :  { %1410 = vmatmul.mubr.msk.f32.gmra.mrb[28].mxu1 %vm51_vm0, %v1694_v32 }
 0x12a   :  { %1412 = vmatprep.mubr.msk.f32.mxu1 %vm1570_vm1, %v1571_v20 }
 0x12d   :  { %1413 = vmatmul.mubr.msk.f32.gmra.mrb[30].mxu1 %vm51_vm0, %v1704_v36 }
 0x1c8   :  { %v323_v48 = vpop.f32.mrb[2].mxu1 }
 0x1c9   :  { %v1330_v49 = vpop.f32.mrb[3].mxu1  ;;  %1055 = vrot.lane.b32.xlu1 %v323_v48, %s1572_s1  ;;  %v1804_v60 = vsel %vm897_vm2, %v323_v48, inf  ;;  %v1807_v61 = vsel %vm897_vm2, %v323_v48, -inf }
 0x1cc   :  { %v328_v50 = vpop.f32.mrb[4].mxu1 }
 0x1cd   :  { %v1333_v51 = vpop.f32.mrb[5].mxu1  ;;  %1057 = vrot.lane.b32.xlu1 %v328_v50, %s1572_s1  ;;  %v899_v4 = vsel %vm897_vm2, %v328_v50, inf  ;;  %v958_v5 = vsel %vm897_vm2, %v328_v50, -inf }
 0x1d0   :  { %v1796_v52 = vpop.f32.mrb[6].mxu1 }
 0x1d1   :  { %v1336_v53 = vpop.f32.mrb[7].mxu1  ;;  %v901_v16 = vsel %vm900_vm3, %v1796_v52, inf  ;;  %v959_v17 = vsel %vm900_vm3, %v1796_v52, -inf }
 0x1d4   :  { %v403_v54 = vpop.f32.mrb[8].mxu1  ;;  %v1798_v55 = vpop.f32.mrb[14].mxu0 }
 0x1d5   :  { %v1343_v56 = vpop.f32.mrb[9].mxu1  ;;  %1061 = vrot.lane.b32.xlu1 %v403_v54, %s1572_s1  ;;  %v1369_v57 = vpop.f32.mrb[15].mxu0  ;;  %v913_v10 = vsel %vm897_vm2, %v1798_v55, inf  ;;  %v971_v11 = vsel %vm897_vm2, %v1798_v55, -inf  ;;  %v902_v30 = vsel %vm897_vm2, %v403_v54, inf  ;;  %v960_v31 = vsel %vm897_vm2, %v403_v54, -inf }
 0x1d8   :  { %v408_v58 = vpop.f32.mrb[10].mxu1  ;;  %v1801_v59 = vpop.f32.mrb[16].mxu0 }
 0x1d9   :  { %v1810_v62 = vsel %vm897_vm2, %v408_v58, inf  ;;  %v1813_v63 = vsel %vm897_vm2, %v408_v58, -inf  ;;  %v1346_v0 = vpop.f32.mrb[11].mxu1  ;;  %1063 = vrot.lane.b32.xlu1 %v408_v58, %s1572_s1  ;;  %v1372_v1 = vpop.f32.mrb[17].mxu0  ;;  %v915_v24 = vsel %vm897_vm2, %v1801_v59, inf  ;;  %v973_v25 = vsel %vm897_vm2, %v1801_v59, -inf }
 0x1da   :  { %v904_v2 = vmin.f32 %v1804_v60, %v1810_v62  ;;  %v962_v3 = vmax.f32 %v1807_v61, %v1813_v63 }
 0x1dc   :  { %v413_v6 = vpop.f32.mrb[12].mxu1  ;;  %v1822_v7 = vpop.f32.mrb[18].mxu0 }
 0x1dd   :  { %v905_v8 = vsel %vm900_vm3, %v413_v6, inf  ;;  %v963_v9 = vsel %vm900_vm3, %v413_v6, -inf  ;;  %v1349_v12 = vpop.f32.mrb[13].mxu1  ;;  %1065 = vrot.lane.b32.xlu1 %v413_v6, %s1572_s1  ;;  %v1375_v13 = vpop.f32.mrb[19].mxu0  ;;  %v917_v38 = vsel %vm900_vm3, %v1822_v7, inf  ;;  %v975_v39 = vsel %vm900_vm3, %v1822_v7, -inf }
 0x1de   :  { %v906_v14 = vmin.f32 %v899_v4, %v905_v8  ;;  %v964_v15 = vmax.f32 %v958_v5, %v963_v9 }
 0x1e0   :  { %v1835_v18 = vmin.f32 %v906_v14, %v913_v10  ;;  %v1837_v19 = vmax.f32 %v964_v15, %v971_v11  ;;  %v483_v20 = vpop.f32.mrb[14].mxu1  ;;  %v1839_v21 = vpop.f32.mrb[20].mxu0 }
 0x1e1   :  { %v907_v22 = vsel %vm897_vm2, %v483_v20, inf  ;;  %v965_v23 = vsel %vm897_vm2, %v483_v20, -inf  ;;  %v1356_v26 = vpop.f32.mrb[15].mxu1  ;;  %1067 = vrot.lane.b32.xlu1 %v483_v20, %s1572_s1  ;;  %v1395_v27 = vpop.f32.mrb[21].mxu0  ;;  %v1865_v44 = vsel %vm897_vm2, %v1839_v21, inf  ;;  %v1869_v45 = vsel %vm897_vm2, %v1839_v21, -inf }
 0x1e2   :  { %v908_v28 = vmin.f32 %v901_v16, %v907_v22  ;;  %v966_v29 = vmax.f32 %v959_v17, %v965_v23 }
 0x1e4   :  { %v1850_v32 = vmin.f32 %v908_v28, %v915_v24  ;;  %v1852_v33 = vmax.f32 %v966_v29, %v973_v25  ;;  %v488_v34 = vpop.f32.mrb[16].mxu1  ;;  %v1854_v35 = vpop.f32.mrb[22].mxu0 }
 0x1e5   :  { %v909_v36 = vsel %vm897_vm2, %v488_v34, inf  ;;  %v967_v37 = vsel %vm897_vm2, %v488_v34, -inf  ;;  %v1359_v40 = vpop.f32.mrb[17].mxu1  ;;  %1069 = vrot.lane.b32.xlu1 %v488_v34, %s1572_s1  ;;  %v1398_v41 = vpop.f32.mrb[23].mxu0  ;;  %v927_v1 = vsel %vm897_vm2, %v1854_v35, inf }
 0x1e6   :  { %v910_v42 = vmin.f32 %v902_v30, %v909_v36  ;;  %v968_v43 = vmax.f32 %v960_v31, %v967_v37 }
 0x1e8   :  { %v1871_v46 = vmin.f32 %v910_v42, %v917_v38  ;;  %v1873_v47 = vmax.f32 %v968_v43, %v975_v39  ;;  %v493_v48 = vpop.f32.mrb[18].mxu1  ;;  %v1875_v49 = vpop.f32.mrb[24].mxu0 }
 0x1e9   :  { %v911_v50 = vsel %vm900_vm3, %v493_v48, inf  ;;  %v969_v51 = vsel %vm900_vm3, %v493_v48, -inf  ;;  %v1362_v53 = vpop.f32.mrb[19].mxu1  ;;  %1071 = vrot.lane.b32.xlu1 %v493_v48, %s1572_s1  ;;  %v1401_v54 = vpop.f32.mrb[25].mxu0  ;;  %v929_v14 = vsel %vm900_vm3, %v1875_v49, inf }
 0x1ea   :  { %v912_v56 = vmin.f32 %v904_v2, %v911_v50  ;;  %v970_v57 = vmax.f32 %v962_v3, %v969_v51  ;;  %v926_v58 = vmin.f32 %v1871_v46, %v1865_v44  ;;  %v984_v60 = vmax.f32 %v1873_v47, %v1869_v45 }
 0x1eb   :  { %v985_v2 = vsel %vm897_vm2, %v1854_v35, -inf }
 0x1ec   :  { %v643_v61 = vpop.f32.mrb[20].mxu1  ;;  %v1884_v62 = vpop.f32.mrb[26].mxu0 }
 0x1ed   :  { %v919_v63 = vsel %vm897_vm2, %v643_v61, inf  ;;  %v977_v0 = vsel %vm897_vm2, %v643_v61, -inf  ;;  %v1382_v3 = vpop.f32.mrb[21].mxu1  ;;  %1075 = vrot.lane.b32.xlu1 %v1801_v59, %s1572_s1  ;;  %v1421_v4 = vpop.f32.mrb[27].mxu0  ;;  %v987_v59 = vsel %vm900_vm3, %v1875_v49, -inf  ;;  %v937_v22 = vsel %vm897_vm2, %v1884_v62, inf }
 0x1ee   :  { %v920_v5 = vmin.f32 %v912_v56, %v919_v63  ;;  %v978_v6 = vmax.f32 %v970_v57, %v977_v0  ;;  %v995_v23 = vsel %vm897_vm2, %v1884_v62, -inf }
 0x1f0   :  { %v928_v8 = vmin.f32 %v920_v5, %v927_v1  ;;  %v986_v9 = vmax.f32 %v978_v6, %v985_v2  ;;  %v1894_v10 = vpop.f32.mrb[22].mxu1  ;;  %v888_v11 = vpop.f32.mrb[28].mxu0 }
 0x1f1   :  { %v921_v12 = vsel %vm897_vm2, %v1894_v10, inf  ;;  %v979_v13 = vsel %vm897_vm2, %v1894_v10, -inf  ;;  %v1385_v15 = vpop.f32.mrb[23].mxu1  ;;  %1079 = vrot.lane.b32.xlu1 %v643_v61, %s1572_s1  ;;  %v1424_v16 = vpop.f32.mrb[29].mxu0  ;;  %v939_v40 = vsel %vm897_vm2, %v888_v11, inf  ;;  %v997_v41 = vsel %vm897_vm2, %v888_v11, -inf }
 0x1f2   :  { %v922_v17 = vmin.f32 %v1835_v18, %v921_v12  ;;  %v980_v20 = vmax.f32 %v1837_v19, %v979_v13 }
 0x1f4   :  { %v930_v24 = vmin.f32 %v922_v17, %v929_v14  ;;  %v988_v25 = vmax.f32 %v980_v20, %v987_v59  ;;  %v653_v26 = vpop.f32.mrb[24].mxu1  ;;  %v893_v27 = vpop.f32.mrb[30].mxu0 }
 0x1f5   :  { %v923_v28 = vsel %vm900_vm3, %v653_v26, inf  ;;  %v981_v29 = vsel %vm900_vm3, %v653_v26, -inf  ;;  %v1388_v30 = vpop.f32.mrb[25].mxu1  ;;  %1083 = vrot.lane.b32.xlu1 %v653_v26, %s1572_s1  ;;  %v1427_v18 = vpop.f32.mrb[31].mxu0  ;;  %v941_v48 = vsel %vm900_vm3, %v893_v27, inf  ;;  %v999_v50 = vsel %vm900_vm3, %v893_v27, -inf }
 0x1f6   :  { %v924_v19 = vmin.f32 %v1850_v32, %v923_v28  ;;  %v982_v31 = vmax.f32 %v1852_v33, %v981_v29  ;;  %v996_v34 = vmax.f32 %v988_v25, %v995_v23  ;;  %v938_v36 = vmin.f32 %v930_v24, %v937_v22 }
 0x1f8   :  { %v803_v37 = vpop.f32.mrb[26].mxu1 }
 0x1f9   :  { %v931_v38 = vsel %vm897_vm2, %v803_v37, inf  ;;  %v989_v39 = vsel %vm897_vm2, %v803_v37, -inf  ;;  %v1408_v42 = vpop.f32.mrb[27].mxu1  ;;  %1087 = vrot.lane.b32.xlu1 %v1854_v35, %s1572_s1 }
 0x1fa   :  { %v932_v43 = vmin.f32 %v924_v19, %v931_v38  ;;  %v990_v44 = vmax.f32 %v982_v31, %v989_v39 }
 0x1fc   :  { %v998_v32 = vmax.f32 %v990_v44, %v997_v41  ;;  %v808_v45 = vpop.f32.mrb[28].mxu1  ;;  %v940_v33 = vmin.f32 %v932_v43, %v939_v40 }
 0x1fd   :  { %v933_v46 = vsel %vm897_vm2, %v808_v45, inf  ;;  %v991_v47 = vsel %vm897_vm2, %v808_v45, -inf  ;;  %v1411_v51 = vpop.f32.mrb[29].mxu1  ;;  %1091 = vrot.lane.b32.xlu1 %v803_v37, %s1572_s1 }
 0x1fe   :  { %v934_v53 = vmin.f32 %v926_v58, %v933_v46  ;;  %v992_v54 = vmax.f32 %v984_v60, %v991_v47 }
 0x200   :  { %v1000_v56 = vmax.f32 %v992_v54, %v999_v50  ;;  %v813_v35 = vpop.f32.mrb[30].mxu1  ;;  %v942_v57 = vmin.f32 %v934_v53, %v941_v48 }
 0x201   :  { %v935_v61 = vsel %vm900_vm3, %v813_v35, inf  ;;  %v993_v63 = vsel %vm900_vm3, %v813_v35, -inf  ;;  %1095 = vrot.lane.b32.xlu1 %v813_v35, %s1572_s1  ;;  %v1414_v0 = vpop.f32.mrb[31].mxu1 }
 0x202   :  { %v994_v1 = vmax.f32 %v986_v9, %v993_v63  ;;  %v936_v2 = vmin.f32 %v928_v8, %v935_v61  ;;  %v944_v3 = vmin.f32 %v940_v33, %v942_v57  ;;  %v1002_v4 = vmax.f32 %v998_v32, %v1000_v56 }
 0x204   :  { %v943_v5 = vmin.f32 %v936_v2, %v938_v36  ;;  %v1001_v6 = vmax.f32 %v994_v1, %v996_v34 }
 0x205   :  { %1099 = vrot.lane.b32.xlu1 %v888_v11, %s1572_s1 }
 0x206   :  { %v945_v58 = vmin.f32 %v943_v5, %v944_v3  ;;  %v1003_v60 = vmax.f32 %v1001_v6, %v1002_v4 }
 0x208   :  { %946 = vmin.xlane.f32.xlu0 %v945_v58 }
 0x20c   :  { %1004 = vmax.xlane.f32.xlu0 %v1003_v60 }
 0x222   :  { %1059 = vrot.lane.b32.xlu0 %v1796_v52, %s1572_s1 }
 0x226   :  { %1073 = vrot.lane.b32.xlu0 %v1798_v55, %s1572_s1 }
 0x22a   :  { %1077 = vrot.lane.b32.xlu0 %v1822_v7, %s1572_s1 }
 0x22e   :  { %1081 = vrot.lane.b32.xlu0 %v1894_v10, %s1572_s1 }
 0x232   :  { %1085 = vrot.lane.b32.xlu0 %v1839_v21, %s1572_s1 }
 0x236   :  { %1089 = vrot.lane.b32.xlu0 %v1875_v49, %s1572_s1 }
 0x23a   :  { %1093 = vrot.lane.b32.xlu0 %v808_v45, %s1572_s1 }
 0x23b   :  { %v1056_v8 = vpop.permute.xlu1 %1055 }
 0x23c   :  { %1128 = vst.msk [vmem:[#allocation5 - $0x6] sm:$0xc0] %vm1127_vm4, %v1056_v8 }
 0x23e   :  { %1097 = vrot.lane.b32.xlu0 %v1884_v62, %s1572_s1 }
 0x23f   :  { %v1058_v52 = vpop.permute.xlu1 %1057 }
 0x240   :  { %1130 = vst.msk [vmem:[#allocation5 + $0x2] sm:$0xff] %vm1129_vm5, %v1058_v52 }
 0x242   :  { %1101 = vrot.lane.b32.xlu0 %v893_v27, %s1572_s1 }
 0x247   :  { %v1062_v55 = vpop.permute.xlu1 %1061 }
 0x248   :  { %1133 = vst.msk [vmem:[#allocation5 + $0xa] sm:$0xc0] %vm1127_vm4, %v1062_v55 }
 0x24b   :  { %v1064_v7 = vpop.permute.xlu1 %1063 }
 0x24c   :  { %1134 = vst.msk [vmem:[#allocation5 + $0x12] sm:$0xff] %vm1129_vm5, %v1064_v7 }
 0x24f   :  { %v1066_v21 = vpop.permute.xlu1 %1065 }
 0x250   :  { %1135 = vst.msk [vmem:[#allocation5 + $0x1a] sm:$0x3] %vm1131_vm6, %v1066_v21 }
 0x253   :  { %v1068_v49 = vpop.permute.xlu1 %1067 }
 0x254   :  { %1136 = vst.msk [vmem:[#allocation5 + $0x1a] sm:$0xc0] %vm1127_vm4, %v1068_v49 }
 0x257   :  { %v1070_v9 = vpop.permute.xlu1 %1069 }
 0x258   :  { %1137 = vst.msk [vmem:[#allocation5 + $0x22] sm:$0xff] %vm1129_vm5, %v1070_v9 }
 0x25b   :  { %v1072_v62 = vpop.permute.xlu1 %1071 }
 0x25c   :  { %1138 = vst.msk [vmem:[#allocation5 + $0x2a] sm:$0x3] %vm1131_vm6, %v1072_v62 }
 0x25f   :  { %v1076_v10 = vpop.permute.xlu1 %1075 }
 0x260   :  { %1140 = vst.msk [vmem:[#allocation5 + $0x32] sm:$0xff] %vm1129_vm5, %v1076_v10 }
 0x263   :  { %v1080_v11 = vpop.permute.xlu1 %1079 }
 0x264   :  { %1142 = vst.msk [vmem:[#allocation5 + $0x3a] sm:$0xc0] %vm1127_vm4, %v1080_v11 }
 0x267   :  { %v1084_v12 = vpop.permute.xlu1 %1083 }
 0x268   :  { %1144 = vst.msk [vmem:[#allocation5 + $0x4a] sm:$0x3] %vm1131_vm6, %v1084_v12 }
 0x26b   :  { %v1088_v13 = vpop.permute.xlu1 %1087 }
 0x26c   :  { %1146 = vst.msk [vmem:[#allocation5 + $0x52] sm:$0xff] %vm1129_vm5, %v1088_v13 }
 0x26f   :  { %v1092_v14 = vpop.permute.xlu1 %1091 }
 0x270   :  { %1148 = vst.msk [vmem:[#allocation5 + $0x5a] sm:$0xc0] %vm1127_vm4, %v1092_v14 }
 0x273   :  { %v1096_v59 = vpop.permute.xlu1 %1095 }
 0x274   :  { %1150 = vst.msk [vmem:[#allocation5 + $0x6a] sm:$0x3] %vm1131_vm6, %v1096_v59 }
 0x277   :  { %v1100_v15 = vpop.permute.xlu1 %1099 }
 0x278   :  { %1152 = vst.msk [vmem:[#allocation5 + $0x72] sm:$0xff] %vm1129_vm5, %v1100_v15 }
 0x295   :  { %v947_v16 = vpop.xlane.xlu0 %946 }
 0x296   :  { %v948_v17 = vrot.slane %v947_v16, 4 }
 0x298   :  { %v949_v20 = vmin.f32 %v947_v16, %v948_v17 }
 0x299   :  { %v1005_v22 = vpop.xlane.xlu0 %1004 }
 0x29a   :  { %v950_v23 = vrot.slane %v949_v20, 2  ;;  %v1006_v24 = vrot.slane %v1005_v22, 4 }
 0x29c   :  { %v1007_v25 = vmax.f32 %v1005_v22, %v1006_v24  ;;  %v951_v26 = vmin.f32 %v949_v20, %v950_v23 }
 0x29d   :  { %v1060_v27 = vpop.permute.xlu0 %1059 }
 0x29e   :  { %v1008_v28 = vrot.slane %v1007_v25, 2  ;;  %1132 = vst.msk [vmem:[#allocation5 + $0xa] sm:$0x3] %vm1131_vm6, %v1060_v27  ;;  %v952_v29 = vrot.slane %v951_v26, 1 }
 0x2a0   :  { %v953_v30 = vmin.f32 %v951_v26, %v952_v29  ;;  %v1009_v18 = vmax.f32 %v1007_v25, %v1008_v28 }
 0x2a1   :  { %v1074_v19 = vpop.permute.xlu0 %1073 }
 0x2a2   :  { %1139 = vst.msk [vmem:[#allocation5 + $0x2a] sm:$0xc0] %vm1127_vm4, %v1074_v19  ;;  %v1010_v31 = vrot.slane %v1009_v18, 1 }
 0x2a3   :  { %1458 = vpush %v953_v30 }
 0x2a4   :  { %v1011_v34 = vmax.f32 %v1009_v18, %v1010_v31 }
 0x2a5   :  { %v1078_v36 = vpop.permute.xlu0 %1077 }
 0x2a6   :  { %1141 = vst.msk [vmem:[#allocation5 + $0x3a] sm:$0x3] %vm1131_vm6, %v1078_v36 }
 0x2a7   :  { %1460 = vpush %v1011_v34 }
 0x2a9   :  { %v1082_v37 = vpop.permute.xlu0 %1081 }
 0x2aa   :  { %1143 = vst.msk [vmem:[#allocation5 + $0x42] sm:$0xff] %vm1129_vm5, %v1082_v37 }
 0x2ad   :  { %v1086_v38 = vpop.permute.xlu0 %1085 }
 0x2ae   :  { %1145 = vst.msk [vmem:[#allocation5 + $0x4a] sm:$0xc0] %vm1127_vm4, %v1086_v38 }
 0x2b1   :  { %v1090_v39 = vpop.permute.xlu0 %1089 }
 0x2b2   :  { %1147 = vst.msk [vmem:[#allocation5 + $0x5a] sm:$0x3] %vm1131_vm6, %v1090_v39 }
 0x2b5   :  { %v1094_v40 = vpop.permute.xlu0 %1093 }
 0x2b6   :  { %1149 = vst.msk [vmem:[#allocation5 + $0x62] sm:$0xff] %vm1129_vm5, %v1094_v40 }
 0x2b9   :  { %v1098_v41 = vpop.permute.xlu0 %1097 }
 0x2ba   :  { %1151 = vst.msk [vmem:[#allocation5 + $0x6a] sm:$0xc0] %vm1127_vm4, %v1098_v41 }
 0x2bd   :  { %v1102_v42 = vpop.permute.xlu0 %1101 }
 0x2be   :  { %1153 = vst.msk [vmem:[#allocation5 + $0x7a] sm:$0x3] %vm1131_vm6, %v1102_v42 }
 0x2bf   :  { %1505 = shalt.err (!%p1502_p12)
}
 0x2c0   :  { %s1506_s20 = scalar_lea.hbm %s2013_s3, 2048 }
 0x2c1   :  { %p1507_p13 = scmp.ne.s32.totalorder %s2013_s3, %s1506_s20  ;;  %p1510_p0 = scmp.lt.u32.totalorder %s1506_s20, %s2013_s3 }
 0x2c3   :  { %p1512_p1 = pnand %p1510_p0, %p1507_p13 }
 0x2c5   :  { %1515 = shalt.err (!%p1512_p1)
}
 0x2c6   :  { %1165 = dma.vmem_to_hbm [thread:$0]  %s1160_s16, 2048, %s2013_s3, [#allocation4], %s1567_s28, %s1567_s28, %s1568_s29  }
 0x2c7   :  { %s1574_s27 = smov [#allocation6]   ;;  %s1575_s7 = smov [#allocation8]  }
 0x2c8   :  { %s1172_s30 = sshll.u32 %s1574_s27, 4  ;;  %s1182_s8 = sshll.u32 %s1575_s7, 4  ;;  %s1173_s30 = int_to_ptr.vmem [resolvable:$true] %s1172_s30  ;;  %s1183_s8 = int_to_ptr.vmem [resolvable:$true] %s1182_s8 }
 0x2c9   :  { %s1516_s9 = scalar_lea.vmem %s1173_s30, 128  ;;  %p1521_p3 = scmp.lt.s32.totalorder %s1173_s30, %s1173_s30 }
 0x2ca   :  { %p1517_p2 = scmp.ne.s32.totalorder %s1173_s30, %s1516_s9  ;;  %p1522_p4 = scmp.lt.s32.totalorder %s1516_s9, %s1516_s9 }
 0x2cc   :  { %p1523_p5 = por %p1522_p4, %p1521_p3 }
 0x2ce   :  { %p1524_p6 = pnand %p1523_p5, %p1517_p2 }
 0x2d4   :  { %s1459_s6 = spop %1458 }
 0x2d5   :  { %v955_v43 = vstv %s1459_s6 }
 0x2d6   :  { %956 = vst [vmem:[#allocation6] sm:$0xff] %v955_v43 }
 0x2d7   :  { %1527 = shalt.err (!%p1524_p6)
}
 0x2d8   :  { %s1528_s2 = scalar_lea.hbm %s2014_s4, 128 }
 0x2d9   :  { %p1529_p7 = scmp.ne.s32.totalorder %s2014_s4, %s1528_s2  ;;  %p1532_p8 = scmp.lt.u32.totalorder %s1528_s2, %s2014_s4 }
 0x2db   :  { %p1534_p9 = pnand %p1532_p8, %p1529_p7 }
 0x2dd   :  { %1537 = shalt.err (!%p1534_p9)
}
 0x2de   :  { %1175 = dma.vmem_to_hbm [thread:$0]  %s1173_s30, 128, %s2014_s4, [#allocation7]  }
 0x2df   :  { %s1461_s14 = spop %1460  ;;  %s1538_s1 = scalar_lea.vmem %s1183_s8, 128 }
 0x2e0   :  { %v1013_v44 = vstv %s1461_s14  ;;  %p1539_p10 = scmp.ne.s32.totalorder %s1183_s8, %s1538_s1  ;;  %p1543_p11 = scmp.lt.s32.totalorder %s1183_s8, %s1183_s8 }
 0x2e1   :  { %1014 = vst [vmem:[#allocation8] sm:$0xff] %v1013_v44  ;;  %p1544_p12 = scmp.lt.s32.totalorder %s1538_s1, %s1538_s1 }
 0x2e3   :  { %p1545_p13 = por %p1544_p12, %p1543_p11 }
 0x2e5   :  { %p1546_p0 = pnand %p1545_p13, %p1539_p10 }
 0x2e7   :  { %1549 = shalt.err (!%p1546_p0)
}
 0x2e8   :  { %s1550_s17 = scalar_lea.hbm %s2015_s5, 128 }
 0x2e9   :  { %p1551_p1 = scmp.ne.s32.totalorder %s2015_s5, %s1550_s17  ;;  %p1554_p2 = scmp.lt.u32.totalorder %s1550_s17, %s2015_s5 }
 0x2eb   :  { %p1556_p3 = pnand %p1554_p2, %p1551_p1 }
 0x2ed   :  { %1559 = shalt.err (!%p1556_p3)
}
 0x2ee   :  { %1185 = dma.vmem_to_hbm [thread:$0]  %s1183_s8, 128, %s2015_s5, [#allocation7]  }
 0x2ef   :  { %1562 = dma.done.wait [#allocation4], 2048  }
 0x2f0   :  { %1563 = vsyncadd [#allocation4], 4294965248 }
 0x2f1   :  { %1564 = dma.done.wait [#allocation7], 256  }
 0x2f2   :  { %1565 = vsyncadd [#allocation7], 4294967040 }
 0x2f3   :  { %1195 = vsyncpa [#allocation3], 1 }
 0x2f4   :  { %1196 = vsyncpa [#allocation4], 1 }
 0x2f5   :  { %1197 = vsyncpa [#allocation7], 1 }

</bundles_post_ra>
